<compile_context>
chip_gen: v6e
topology: v6e:2x2x1
jax: 0.10.0
libtpu: 0.0.40
codegen_flags: <defaults>
</compile_context>

<pallas_src>
import jax
import jax.numpy as jnp
from jax import lax
from jax.experimental import pallas as pl
from jax.experimental.pallas import tpu as pltpu

_LANE = 128
_MIB = 1 << 20

# VMEM working-set budgets (bytes). Conservative enough for v7x's 64 MiB physical
# VMEM (the tightest generation) while still allowing 512x512 output tiles with
# TK up to 2048 in f32.
_FAST_BUDGET = 28 * _MIB
_TILED_BUDGET = 28 * _MIB
_TK_MAX = 2048


def _round_up(x: int, m: int) -> int:
    return -(-x // m) * m


def _sublane(dtype) -> int:
    # Sublane packing granule: f32 -> 8, bf16/f16 -> 16, int8/fp8 -> 32.
    return max(8, 32 // jnp.dtype(dtype).itemsize)


def _pick_tile(dim: int, grain: int, cap: int) -> int:
    """Tile size: multiple of `grain`, <= cap (cap must be a multiple of grain).

    Prefers an exact divisor of the grain-aligned dim (no padding); falls back to
    `cap` with zero-padding when the best exact divisor is less than half the cap.
    """
    aligned = _round_up(dim, grain)
    if aligned <= cap:
        return aligned
    best = grain
    t = grain
    while t <= cap:
        if aligned % t == 0:
            best = t
        t += grain
    return best if 2 * best >= cap else cap


def _pad2(a, rows: int, cols: int):
    pr = rows - a.shape[0]
    pc = cols - a.shape[1]
    if pr or pc:
        a = jnp.pad(a, ((0, pr), (0, pc)))
    return a


def _resident_kernel(x_ref, w_ref, b_ref, o_ref):
    """Weight-resident path: full (Np, Kp) weight held in VMEM, one dot per M tile."""
    y = lax.dot_general(
        x_ref[...],
        w_ref[...],
        dimension_numbers=(((1,), (1,)), ((), ())),   # y = x @ W.T on the MXU
        preferred_element_type=jnp.float32,
    )
    o_ref[...] = (y + b_ref[...].astype(jnp.float32)).astype(o_ref.dtype)


def _tiled_kernel(x_ref, w_ref, b_ref, o_ref, acc_ref):
    """Tiled (M, N, K) path with an f32 accumulator resident across the K axis."""
    k = pl.program_id(2)

    @pl.when(k == 0)
    def _init():
        acc_ref[...] = jnp.zeros_like(acc_ref)

    acc_ref[...] += lax.dot_general(
        x_ref[...],
        w_ref[...],
        dimension_numbers=(((1,), (1,)), ((), ())),   # y = x @ W.T
        preferred_element_type=jnp.float32,
    )

    @pl.when(k == pl.num_programs(2) - 1)
    def _finalize():
        o_ref[...] = (acc_ref[...] + b_ref[...].astype(jnp.float32)).astype(o_ref.dtype)


def dff_self_output(hidden_states, input_tensor, weight, bias):
    """Pallas implementation of DFFSelfOutput.forward (eval mode).

    hidden_states: [..., H]
    input_tensor:  [..., H]  (unused -- residual is applied in DFFLayer, per module docstring)
    weight:        [H, H]    PyTorch nn.Linear weight (out_features, in_features)
    bias:          [H]
    """
    del input_tensor  # residual connection is defined in DFFLayer, not here

    orig_shape = hidden_states.shape
    K = orig_shape[-1]
    x2d = hidden_states.reshape(-1, K)
    M = x2d.shape[0]
    N = weight.shape[0]

    x_isz = jnp.dtype(x2d.dtype).itemsize
    w_isz = jnp.dtype(weight.dtype).itemsize
    o_dtype = hidden_states.dtype
    o_isz = jnp.dtype(o_dtype).itemsize

    # ---- tile selection ----------------------------------------------------
    TM = _pick_tile(M, _sublane(x2d.dtype), 512)
    TN = _pick_tile(N, _LANE, 512)
    Mp = _round_up(M, TM)
    Np = _round_up(N, TN)
    Kp_full = _round_up(K, _LANE)

    b2d = bias.reshape(1, N)

    cost = pl.CostEstimate(
        flops=2 * M * N * K,
        transcendentals=0,
        bytes_accessed=(M * K * x_isz + N * K * w_isz
                        + N * jnp.dtype(bias.dtype).itemsize + M * N * o_isz),
    )

    # ---- fast path: whole weight resident in VMEM ---------------------------
    fast_bytes = (2 * Np * Kp_full * w_isz      # weight (counted double-buffered, conservative)
                  + 2 * TM * Kp_full * x_isz    # double-buffered x tile
                  + 2 * TM * Np * o_isz         # double-buffered out tile
                  + 2 * Np * 4)                 # bias
    if fast_bytes <= _FAST_BUDGET:
        xp = _pad2(x2d, Mp, Kp_full)
        wp = _pad2(weight, Np, Kp_full)
        bp = _pad2(b2d, 1, Np)
        vmem_limit = int(min(max(fast_bytes + 8 * _MIB, 32 * _MIB), 56 * _MIB))

        out_p = pl.pallas_call(
            _resident_kernel,
            out_shape=jax.ShapeDtypeStruct((Mp, Np), o_dtype),
            grid_spec=pltpu.PrefetchScalarGridSpec(
                num_scalar_prefetch=0,
                grid=(Mp // TM,),
                in_specs=[
                    pl.BlockSpec((TM, Kp_full), lambda i: (i, 0)),   # x tile (streamed)
                    pl.BlockSpec((Np, Kp_full), lambda i: (0, 0)),   # weight (constant idx -> DMA'd once)
                    pl.BlockSpec((1, Np), lambda i: (0, 0)),         # bias
                ],
                out_specs=pl.BlockSpec((TM, Np), lambda i: (i, 0)),
            ),
            compiler_params=pltpu.CompilerParams(
                dimension_semantics=("parallel",),
                vmem_limit_bytes=vmem_limit,
            ),
            cost_estimate=cost,
        )(xp, wp, bp)
    else:
        # ---- tiled (M, N, K) path -------------------------------------------
        fixed = 2 * TM * TN * o_isz + TM * TN * 4 + 2 * TN * 4
        per_k = 2 * (TM * x_isz + TN * w_isz)
        tk_cap = max(_LANE,
                     min(_TK_MAX, ((_TILED_BUDGET - fixed) // per_k) // _LANE * _LANE))
        TK = _pick_tile(K, _LANE, tk_cap)
        Kp = _round_up(K, TK)

        xp = _pad2(x2d, Mp, Kp)
        wp = _pad2(weight, Np, Kp)
        bp = _pad2(b2d, 1, Np)

        working = (2 * TM * TK * x_isz + 2 * TN * TK * w_isz
                   + 2 * TM * TN * o_isz + TM * TN * 4 + 2 * TN * 4)
        vmem_limit = int(min(max(working + 8 * _MIB, 32 * _MIB), 56 * _MIB))

        out_p = pl.pallas_call(
            _tiled_kernel,
            out_shape=jax.ShapeDtypeStruct((Mp, Np), o_dtype),
            grid_spec=pltpu.PrefetchScalarGridSpec(
                num_scalar_prefetch=0,
                grid=(Mp // TM, Np // TN, Kp // TK),
                in_specs=[
                    pl.BlockSpec((TM, TK), lambda i, j, k: (i, k)),   # x tile
                    pl.BlockSpec((TN, TK), lambda i, j, k: (j, k)),   # W tile (ignores i)
                    pl.BlockSpec((1, TN), lambda i, j, k: (0, j)),    # bias tile
                ],
                out_specs=pl.BlockSpec((TM, TN), lambda i, j, k: (i, j)),
                scratch_shapes=[pltpu.VMEM((TM, TN), jnp.float32)],
            ),
            compiler_params=pltpu.CompilerParams(
                dimension_semantics=("parallel", "parallel", "arbitrary"),
                vmem_limit_bytes=vmem_limit,
            ),
            cost_estimate=cost,
        )(xp, wp, bp)

    out = out_p[:M, :N]
    return out.reshape(orig_shape[:-1] + (N,))


if __name__ == "__main__":
    def _ref(hs, w, b):
        h = hs.shape[-1]
        return (hs.reshape(-1, h) @ w.T + b).reshape(hs.shape[:-1] + (w.shape[0],))

    # 1) Small config matching the module (batch=2, seq=8, hidden=32): fast path, padded lanes.
    B, S, H = 2, 8, 32
    key = jax.random.PRNGKey(0)
    k_x, k_res, k_w, k_b = jax.random.split(key, 4)
    hs = jax.random.normal(k_x, (B, S, H), dtype=jnp.float32)
    res = jax.random.normal(k_res, (B, S, H), dtype=jnp.float32)
    w = jax.random.normal(k_w, (H, H), dtype=jnp.float32) * (1.0 / jnp.sqrt(H))
    b = jax.random.normal(k_b, (H,), dtype=jnp.float32) * 0.5
    out = jax.block_until_ready(dff_self_output(hs, res, w, b))
    assert out.shape == (B, S, H)
    assert jnp.allclose(out, _ref(hs, w, b), atol=1e-3, rtol=1e-3), "mismatch (small)"

    # 2) Ragged shapes exercising zero-padding of M/N/K (still fast path).
    B2, S2, H2 = 3, 85, 96
    k2x, k2w, k2b = jax.random.split(jax.random.PRNGKey(1), 3)
    hs2 = jax.random.normal(k2x, (B2, S2, H2), dtype=jnp.float32)
    w2 = jax.random.normal(k2w, (H2, H2), dtype=jnp.float32) * (1.0 / jnp.sqrt(H2))
    b2 = jax.random.normal(k2b, (H2,), dtype=jnp.float32) * 0.5
    out2 = jax.block_until_ready(dff_self_output(hs2, hs2, w2, b2))
    assert out2.shape == (B2, S2, H2)
    assert jnp.allclose(out2, _ref(hs2, w2, b2), atol=1e-2, rtol=1e-2), "mismatch (ragged)"

    # 3) Large hidden size forcing the tiled (M, N, K) accumulator path (multi-step K).
    B3, S3, H3 = 2, 64, 4096
    k3x, k3w, k3b = jax.random.split(jax.random.PRNGKey(2), 3)
    hs3 = jax.random.normal(k3x, (B3, S3, H3), dtype=jnp.float32)
    w3 = jax.random.normal(k3w, (H3, H3), dtype=jnp.float32) * (1.0 / jnp.sqrt(H3))
    b3 = jax.random.normal(k3b, (H3,), dtype=jnp.float32) * 0.5
    out3 = jax.block_until_ready(dff_self_output(hs3, hs3, w3, b3))
    assert out3.shape == (B3, S3, H3)
    assert jnp.allclose(out3, _ref(hs3, w3, b3), atol=5e-2, rtol=5e-2), "mismatch (tiled)"

    print("KERNEL_OK")
</pallas_src>

<mosaic_0001>
module attributes {stable_mosaic.version = 11 : i64} {
  func.func @_resident_kernel(%arg0: i32, %arg1: memref<16x128xf32, #tpu.memory_space<vmem>>, %arg2: memref<128x128xf32, #tpu.memory_space<vmem>>, %arg3: memref<1x128xf32, #tpu.memory_space<vmem>>, %arg4: memref<16x128xf32, #tpu.memory_space<vmem>>) attributes {dimension_semantics = [#tpu.dimension_semantics<parallel>], iteration_bounds = array<i64: 1>, scalar_prefetch = 0 : i64, scratch_operands = 0 : i64, tpu.core_type = #tpu.core_type<tc>, window_params = [{transform_indices = @transform_0, window_bounds = array<i64: 16, 128>}, {pipeline_mode = #tpu.pipeline_mode<synchronous>, transform_indices = @transform_1, window_bounds = array<i64: 128, 128>}, {pipeline_mode = #tpu.pipeline_mode<synchronous>, transform_indices = @transform_2, window_bounds = array<i64: 1, 128>}, {transform_indices = @transform_3, window_bounds = array<i64: 16, 128>}]} {
    %c0 = arith.constant 0 : index
    %c0_0 = arith.constant 0 : index
    %0 = vector.load %arg1[%c0, %c0_0] : memref<16x128xf32, #tpu.memory_space<vmem>>, vector<16x128xf32>
    %c0_1 = arith.constant 0 : index
    %c0_2 = arith.constant 0 : index
    %1 = vector.load %arg2[%c0_1, %c0_2] : memref<128x128xf32, #tpu.memory_space<vmem>>, vector<128x128xf32>
    %cst = arith.constant dense<0.000000e+00> : vector<16x128xf32>
    %2 = tpu.matmul %0, %1, %cst {dimension_numbers = #tpu.dot_dimension_numbers<[1], [1], [0], [0], [0, 0, 1, 0], [], []>} : vector<16x128xf32>, vector<128x128xf32>, vector<16x128xf32> -> vector<16x128xf32>
    %c0_3 = arith.constant 0 : index
    %c0_4 = arith.constant 0 : index
    %3 = vector.load %arg3[%c0_3, %c0_4] : memref<1x128xf32, #tpu.memory_space<vmem>>, vector<1x128xf32>
    %4 = vector.broadcast %3 : vector<1x128xf32> to vector<16x128xf32>
    %5 = arith.addf %2, %4 : vector<16x128xf32>
    %c0_5 = arith.constant 0 : index
    %c0_6 = arith.constant 0 : index
    %6 = vector.load %arg4[%c0_5, %c0_6] : memref<16x128xf32, #tpu.memory_space<vmem>>, vector<16x128xf32>
    tpu.vector_store %arg4[%c0_5, %c0_6], %5 {strides = array<i32>} : memref<16x128xf32, #tpu.memory_space<vmem>>, vector<16x128xf32>,
    return
  }
  func.func @transform_0(%arg0: i32) -> (i32, i32) {
    %c0_i32 = arith.constant 0 : i32
    %c0_i32_0 = arith.constant 0 : i32
    return %arg0, %c0_i32 : i32, i32
  }
  func.func @transform_1(%arg0: i32) -> (i32, i32) {
    %c0_i32 = arith.constant 0 : i32
    %c0_i32_0 = arith.constant 0 : i32
    %c0_i32_1 = arith.constant 0 : i32
    return %c0_i32, %c0_i32_0 : i32, i32
  }
  func.func @transform_2(%arg0: i32) -> (i32, i32) {
    %c0_i32 = arith.constant 0 : i32
    %c0_i32_0 = arith.constant 0 : i32
    %c0_i32_1 = arith.constant 0 : i32
    return %c0_i32, %c0_i32_0 : i32, i32
  }
  func.func @transform_3(%arg0: i32) -> (i32, i32) {
    %c0_i32 = arith.constant 0 : i32
    %c0_i32_0 = arith.constant 0 : i32
    return %arg0, %c0_i32 : i32, i32
  }
}

</mosaic_0001>

<bundles_post_ra>
// kernel: tpu_custom_call.1
= control target key start
LH: loop header
LB: loop body
LE: loop exit
PB: predicated region body
PF: predicated region fallthrough
CT: control target
= control target key end

     0   :  { %8 = vsyncpa [#allocation3], 0  ;;  %s334_s0 = inlined_call_operand.hbm [shape: f32[16,128], index: 0, kind: input, shape index: {}]   ;;  %s335_s1 = inlined_call_operand.hbm [shape: f32[128,128], index: 1, kind: input, shape index: {}]   ;;  %s336_s2 = inlined_call_operand.vmem [shape: f32[1,128], index: 2, kind: input, shape index: {}]   ;;  %s337_s3 = inlined_call_operand.hbm [shape: f32[16,128], index: 3, kind: output, shape index: {}]  }
   0x1   :  { %9 = vsyncpa [#allocation6], 0 }
   0x2   :  { %10 = vsyncpa [#allocation4], 0  ;;  %s288_s12 = smov [#allocation2]  }
   0x3   :  { %s16_s13 = sshll.u32 %s288_s12, 4  ;;  %s17_s13 = int_to_ptr.vmem [resolvable:$true] %s16_s13 }
   0x4   :  { %s230_s14 = scalar_lea.vmem %s17_s13, 256  ;;  %p235_p1 = scmp.lt.s32.totalorder %s17_s13, %s17_s13 }
   0x5   :  { %p231_p0 = scmp.ne.s32.totalorder %s17_s13, %s230_s14  ;;  %p236_p2 = scmp.lt.s32.totalorder %s230_s14, %s230_s14 }
   0x7   :  { %p237_p3 = por %p236_p2, %p235_p1 }
   0x9   :  { %p238_p4 = pnand %p237_p3, %p231_p0 }
   0xb   :  { %241 = shalt.err (!%p238_p4)
}
   0xc   :  { %s289_s15 = smov 128   ;;  %s290_s16 = smov 8  }
   0xd   :  { %22 = dma.hbm_to_vmem [thread:$0]  %s334_s0, 256, %s17_s13, [#allocation3], %s289_s15, %s289_s15, %s290_s16  }
   0xe   :  { %s291_s19 = smov [#allocation5]  }
   0xf   :  { %s28_s20 = sshll.u32 %s291_s19, 4  ;;  %s29_s20 = int_to_ptr.vmem [resolvable:$true] %s28_s20 }
  0x10   :  { %s250_s21 = scalar_lea.vmem %s29_s20, 2048  ;;  %p255_p6 = scmp.lt.s32.totalorder %s29_s20, %s29_s20 }
  0x11   :  { %p251_p5 = scmp.ne.s32.totalorder %s29_s20, %s250_s21  ;;  %p256_p7 = scmp.lt.s32.totalorder %s250_s21, %s250_s21 }
  0x13   :  { %p257_p8 = por %p256_p7, %p255_p6 }
  0x15   :  { %p258_p9 = pnand %p257_p8, %p251_p5 }
  0x17   :  { %261 = shalt.err (!%p258_p9)
}
  0x18   :  { %34 = dma.hbm_to_vmem [thread:$0]  %s335_s1, 2048, %s29_s20, [#allocation6], %s289_s15, %s289_s15, %s290_s16  }
  0x19   :  { %282 = dma.done.wait [#allocation3], 256  }
  0x1a   :  { %283 = vsyncadd [#allocation3], 4294967040 }
  0x1b   :  { %284 = dma.done.wait [#allocation6], 2048  }
  0x1c   :  { %285 = vsyncadd [#allocation6], 4294965248  ;;  %v60_v0 = vld [vmem:[#allocation5 + $0x78] sm:$0xff]  ;;  %v59_v1 = vld [vmem:[#allocation5 + $0x70] sm:$0xff]  ;;  %s292_s24 = smov [#allocation7]  }
  0x1d   :  { %182 = vmatprep.subr.mxu0 %v60_v0  ;;  %v58_v2 = vld [vmem:[#allocation5 + $0x68] sm:$0xff]  ;;  %v43_v3 = vld [vmem:[#allocation2] sm:$0xff]  ;;  %v57_v4 = vld [vmem:[#allocation5 + $0x60] sm:$0xff]  ;;  %s150_s25 = sshll.u32 %s292_s24, 4  ;;  %s151_s25 = int_to_ptr.vmem [resolvable:$true] %s150_s25 }
  0x1e   :  { %183 = vmatpush3.xpose.msra.mxu0 %v60_v0  ;;  %214 = vmatprep.mubr.f32.mxu0 %v43_v3  ;;  %v56_v5 = vld [vmem:[#allocation5 + $0x58] sm:$0xff]  ;;  %v55_v6 = vld [vmem:[#allocation5 + $0x50] sm:$0xff]  ;;  %v54_v7 = vld [vmem:[#allocation5 + $0x48] sm:$0xff]  ;;  %s262_s26 = scalar_lea.vmem %s151_s25, 256  ;;  %p267_p11 = scmp.lt.s32.totalorder %s151_s25, %s151_s25 }
  0x1f   :  { %184 = vmatprep.subr.mxu0 %v59_v1  ;;  %v53_v8 = vld [vmem:[#allocation5 + $0x40] sm:$0xff]  ;;  %v52_v9 = vld [vmem:[#allocation5 + $0x38] sm:$0xff]  ;;  %v51_v10 = vld [vmem:[#allocation5 + $0x30] sm:$0xff]  ;;  %p263_p10 = scmp.ne.s32.totalorder %s151_s25, %s262_s26  ;;  %p268_p12 = scmp.lt.s32.totalorder %s262_s26, %s262_s26 }
  0x20   :  { %v50_v11 = vld [vmem:[#allocation5 + $0x28] sm:$0xff]  ;;  %v49_v12 = vld [vmem:[#allocation5 + $0x20] sm:$0xff]  ;;  %v48_v13 = vld [vmem:[#allocation5 + $0x18] sm:$0xff] }
  0x21   :  { %v47_v14 = vld [vmem:[#allocation5 + $0x10] sm:$0xff]  ;;  %v46_v15 = vld [vmem:[#allocation5 + $0x8] sm:$0xff]  ;;  %v45_v16 = vld [vmem:[#allocation5] sm:$0xff]  ;;  %p269_p13 = por %p268_p12, %p267_p11 }
  0x22   :  { %185 = vmatpush3.xpose.msra.mxu0 %v59_v1  ;;  %v44_v17 = vld [vmem:[#allocation2 + $0x8] sm:$0xff]  ;;  %v163_v18 = vld [vmem:[%s336_s2] ss:$0 sm:$0xff] }
  0x23   :  { %186 = vmatprep.subr.mxu0 %v58_v2  ;;  %p270_p0 = pnand %p269_p13, %p263_p10 }
  0x26   :  { %187 = vmatpush3.xpose.msra.mxu0 %v58_v2 }
  0x27   :  { %188 = vmatprep.subr.mxu0 %v57_v4 }
  0x2a   :  { %189 = vmatpush3.xpose.msra.mxu0 %v57_v4 }
  0x2b   :  { %190 = vmatprep.subr.mxu0 %v56_v5 }
  0x2e   :  { %191 = vmatpush3.xpose.msra.mxu0 %v56_v5 }
  0x2f   :  { %192 = vmatprep.subr.mxu0 %v55_v6 }
  0x32   :  { %193 = vmatpush3.xpose.msra.mxu0 %v55_v6 }
  0x33   :  { %194 = vmatprep.subr.mxu0 %v54_v7 }
  0x36   :  { %195 = vmatpush3.xpose.msra.mxu0 %v54_v7 }
  0x37   :  { %196 = vmatprep.subr.mxu0 %v53_v8 }
  0x3a   :  { %197 = vmatpush3.xpose.msra.mxu0 %v53_v8 }
  0x3b   :  { %198 = vmatprep.subr.mxu0 %v52_v9 }
  0x3e   :  { %199 = vmatpush3.xpose.msra.mxu0 %v52_v9 }
  0x3f   :  { %200 = vmatprep.subr.mxu0 %v51_v10 }
  0x42   :  { %201 = vmatpush3.xpose.msra.mxu0 %v51_v10 }
  0x43   :  { %202 = vmatprep.subr.mxu0 %v50_v11 }
  0x46   :  { %203 = vmatpush3.xpose.msra.mxu0 %v50_v11 }
  0x47   :  { %204 = vmatprep.subr.mxu0 %v49_v12 }
  0x4a   :  { %205 = vmatpush3.xpose.msra.mxu0 %v49_v12 }
  0x4b   :  { %206 = vmatprep.subr.mxu0 %v48_v13 }
  0x4e   :  { %207 = vmatpush3.xpose.msra.mxu0 %v48_v13 }
  0x4f   :  { %208 = vmatprep.subr.mxu0 %v47_v14 }
  0x52   :  { %209 = vmatpush3.xpose.msra.mxu0 %v47_v14 }
  0x53   :  { %210 = vmatprep.subr.mxu0 %v46_v15 }
  0x56   :  { %211 = vmatpush3.xpose.msra.mxu0 %v46_v15 }
  0x57   :  { %212 = vmatprep.subr.mxu0 %v45_v16 }
  0x5a   :  { %213 = vmatpush3.xpose.msra.mxu0 %v45_v16 }
  0x5d   :  { %215 = vmatmul.mubr.f32.vlgmr.msra.gmra.mxu0 %v44_v17 }
 0x11d   :  { %v216_v19 = vpop.f32.mrf.mxu0 }
 0x11e   :  { %v140_v20 = vadd.f32 %v216_v19, %v163_v18 }
 0x11f   :  { %v134_v21 = vpop.f32.mrf.mxu0 }
 0x120   :  { %144 = vst [vmem:[#allocation7 + $0x8] sm:$0xff] %v140_v20  ;;  %v135_v22 = vadd.f32 %v163_v18, %v134_v21 }
 0x122   :  { %143 = vst [vmem:[#allocation7] sm:$0xff] %v135_v22 }
 0x123   :  { %273 = shalt.err (!%p270_p0)
}
 0x124   :  { %156 = dma.vmem_to_hbm [thread:$0]  %s151_s25, 256, %s337_s3, [#allocation4], %s289_s15, %s289_s15, %s290_s16  }
 0x125   :  { %286 = dma.done.wait [#allocation4], 256  }
 0x126   :  { %287 = vsyncadd [#allocation4], 4294967040 }
 0x127   :  { %160 = vsyncpa [#allocation3], 1 }
 0x128   :  { %161 = vsyncpa [#allocation6], 1 }
 0x129   :  { %162 = vsyncpa [#allocation4], 1 }

</bundles_post_ra>
